<compile_context>
chip_gen: v5e
topology: v5e:2x2
jax: 0.10.0
libtpu: 0.0.40
codegen_flags: <defaults>
</compile_context>

<pallas_src>
import jax
import jax.numpy as jnp
from jax.experimental import pallas as pl
from jax.experimental.pallas import tpu as pltpu
import numpy as np


def make_rnn_fc_kernel(seq, batch):
    """Builds the kernel with static seq/batch baked in (full unroll)."""

    def kernel(x_ref, pk_ref, w_hh_ref, fc_b_ref, o_ref):
        """Whole-sequence RNN + FC in one invocation.

        x_ref    : (seq*batch, 1)   VMEM  inputs, row index = t*batch + b
                                          (input_size == 1 is hard-coded by the
                                           model's forward: x[:, :, None])
        pk_ref   : (3, hidden)      VMEM  packed small operands:
                                          row 0 = W_ih (hidden,1) laid out as a row
                                          row 1 = b_ih + b_hh
                                          row 2 = fc weight (1, hidden) row
        w_hh_ref : (hidden, hidden) VMEM  W_hh ALREADY TRANSPOSED by the wrapper
                                          (kernel computes h @ W_hh^T)
        fc_b_ref : (1,)             SMEM  Linear bias scalar
        o_ref    : (seq*batch, 1)   VMEM  per-step FC outputs, row = t*batch + b
        """
        hidden = w_hh_ref.shape[0]

        w_ih_row = pk_ref[0:1, :]          # (1, hidden)
        bias_row = pk_ref[1:2, :]          # (1, hidden)  b_ih + b_hh
        fc_w_row = pk_ref[2:3, :]          # (1, hidden)
        w_hh_t = w_hh_ref[...]             # (hidden, hidden)

        # Hoisted off the serial chain: input projection + bias for ALL steps
        # as one (seq*batch, 1) @ (1, hidden) outer product -> already in the
        # (sublane = step*batch, lane = hidden) layout used by the recurrence.
        inp_all = (
            jnp.dot(x_ref[...], w_ih_row, preferred_element_type=jnp.float32)
            + bias_row
        )                                  # (seq*batch, hidden)

        fc_b = fc_b_ref[0]

        # Serial recurrence, fully unrolled (seq is small & static).  FC for
        # step t is computed inside the loop so its VPU mul + XLU reduce hide
        # under the MXU/EUP latency of the next step.
        h = jnp.zeros((batch, hidden), jnp.float32)
        ys = []
        for t in range(seq):
            inp_t = inp_all[t * batch:(t + 1) * batch, :]          # (batch, hidden)
            rec = jnp.dot(h, w_hh_t, preferred_element_type=jnp.float32)
            h = jnp.tanh(inp_t + rec)
            y_t = jnp.sum(h * fc_w_row, axis=-1, keepdims=True) + fc_b  # (batch, 1)
            ys.append(y_t)

        # One store, in the layout the data already has (no transpose).
        y = jnp.concatenate(ys, axis=0)                            # (seq*batch, 1)
        o_ref[...] = y.astype(o_ref.dtype)

    return kernel


def net_forward(x, params):
    """x: (seq, batch) float32.  Returns (seq, batch), matching Net.forward."""
    seq, batch = x.shape
    hidden = params["w_hh"].shape[0]

    # Contiguous reshape: row index = t*batch + b (free).
    x_col = x.astype(jnp.float32).reshape(seq * batch, 1)

    # Pack the three tiny (hidden,)-wide operands into one array (one DMA).
    packed = jnp.stack(
        [
            params["w_ih"].reshape(hidden),            # (hidden, 1) -> row
            params["b_ih"] + params["b_hh"],           # fused bias
            params["fc_w"].reshape(hidden),            # (1, hidden) -> row
        ],
        axis=0,
    ).astype(jnp.float32)                              # (3, hidden)

    # NOTE: transposed HERE so the kernel can do h @ W_hh^T directly.
    w_hh_t = params["w_hh"].T.astype(jnp.float32)      # (hidden, hidden)
    fc_b = params["fc_b"].reshape(1).astype(jnp.float32)

    vmem = pl.BlockSpec(memory_space=pltpu.MemorySpace.VMEM)
    smem = pl.BlockSpec(memory_space=pltpu.MemorySpace.SMEM)

    out = pl.pallas_call(
        make_rnn_fc_kernel(seq, batch),
        out_shape=jax.ShapeDtypeStruct((seq * batch, 1), jnp.float32),
        in_specs=[vmem, vmem, vmem, smem],
        out_specs=vmem,
    )(x_col, packed, w_hh_t, fc_b)

    return out.reshape(seq, batch)                     # row t*batch+b -> [t, b]


def ref_forward(x, params):
    """Pure-JAX reference matching torch.nn.RNN + Linear semantics."""
    seq, batch = x.shape
    hidden = params["w_hh"].shape[0]
    h = jnp.zeros((batch, hidden), jnp.float32)
    outs = []
    for t in range(seq):
        x_t = x[t][:, None]                                   # (batch, 1)
        h = jnp.tanh(x_t @ params["w_ih"].T + params["b_ih"]
                     + h @ params["w_hh"].T + params["b_hh"])
        outs.append(h @ params["fc_w"].T + params["fc_b"])    # (batch, 1)
    return jnp.stack(outs, axis=0)[:, :, 0]                   # (seq, batch)


def init_params(key, input_size, hidden_size):
    """Deterministic init mirroring PyTorch's U(-1/sqrt(H), 1/sqrt(H))."""
    k = 1.0 / np.sqrt(hidden_size)
    keys = jax.random.split(key, 6)
    u = lambda kk, shape: jax.random.uniform(kk, shape, jnp.float32, -k, k)
    return {
        "w_ih": u(keys[0], (hidden_size, input_size)),
        "w_hh": u(keys[1], (hidden_size, hidden_size)),
        "b_ih": u(keys[2], (hidden_size,)),
        "b_hh": u(keys[3], (hidden_size,)),
        "fc_w": u(keys[4], (1, hidden_size)),
        "fc_b": u(keys[5], (1,)),
    }


if __name__ == "__main__":
    input_size = 1      # forced by forward(): x[:, :, None] feeds input_size == 1
    hidden_size = 32
    seq_len = 8
    batch = 2

    key = jax.random.PRNGKey(0)
    k_x, k_p = jax.random.split(key)
    x = jax.random.normal(k_x, (seq_len, batch), jnp.float32)
    params = init_params(k_p, input_size, hidden_size)

    y = net_forward(x, params)
    jax.block_until_ready(y)

    y_ref = ref_forward(x, params)
    np.testing.assert_allclose(np.asarray(y), np.asarray(y_ref),
                               rtol=1e-5, atol=1e-5)
    print("KERNEL_OK")
</pallas_src>

<mosaic_0001>
module attributes {stable_mosaic.version = 11 : i64} {
  func.func @kernel(%arg0: memref<16x1xf32, #tpu.memory_space<vmem>>, %arg1: memref<3x32xf32, #tpu.memory_space<vmem>>, %arg2: memref<32x32xf32, #tpu.memory_space<vmem>>, %arg3: memref<1xf32, #tpu.memory_space<smem>>, %arg4: memref<16x1xf32, #tpu.memory_space<vmem>>) attributes {dimension_semantics = [], scalar_prefetch = 0 : i64, scratch_operands = 0 : i64, tpu.core_type = #tpu.core_type<tc>} {
    %c0 = arith.constant 0 : index
    %c0_0 = arith.constant 0 : index
    %0 = vector.load %arg1[%c0, %c0_0] : memref<3x32xf32, #tpu.memory_space<vmem>>, vector<1x32xf32>
    %c1 = arith.constant 1 : index
    %c0_1 = arith.constant 0 : index
    %1 = vector.load %arg1[%c1, %c0_1] : memref<3x32xf32, #tpu.memory_space<vmem>>, vector<1x32xf32>
    %c2 = arith.constant 2 : index
    %c0_2 = arith.constant 0 : index
    %2 = vector.load %arg1[%c2, %c0_2] : memref<3x32xf32, #tpu.memory_space<vmem>>, vector<1x32xf32>
    %c0_3 = arith.constant 0 : index
    %c0_4 = arith.constant 0 : index
    %3 = vector.load %arg2[%c0_3, %c0_4] : memref<32x32xf32, #tpu.memory_space<vmem>>, vector<32x32xf32>
    %c0_5 = arith.constant 0 : index
    %c0_6 = arith.constant 0 : index
    %4 = vector.load %arg0[%c0_5, %c0_6] : memref<16x1xf32, #tpu.memory_space<vmem>>, vector<16x1xf32>
    %cst = arith.constant dense<0.000000e+00> : vector<16x32xf32>
    %5 = tpu.matmul %4, %0, %cst {dimension_numbers = #tpu.dot_dimension_numbers<[1], [0], [0], [1], [0, 0, 1, 1], [], []>} : vector<16x1xf32>, vector<1x32xf32>, vector<16x32xf32> -> vector<16x32xf32>
    %6 = vector.broadcast %1 : vector<1x32xf32> to vector<16x32xf32>
    %7 = arith.addf %5, %6 : vector<16x32xf32>
    %c0_7 = arith.constant 0 : index
    %8 = memref.load %arg3[%c0_7] : memref<1xf32, #tpu.memory_space<smem>>
    %cst_8 = arith.constant 0.000000e+00 : f32
    %9 = vector.broadcast %cst_8 : f32 to vector<2x32xf32>
    %10 = vector.extract_strided_slice %7 {offsets = [0, 0], sizes = [2, 32], strides = [1, 1]} : vector<16x32xf32> to vector<2x32xf32>
    %cst_9 = arith.constant dense<0.000000e+00> : vector<2x32xf32>
    %11 = tpu.matmul %9, %3, %cst_9 {dimension_numbers = #tpu.dot_dimension_numbers<[1], [0], [0], [1], [0, 0, 1, 1], [], []>} : vector<2x32xf32>, vector<32x32xf32>, vector<2x32xf32> -> vector<2x32xf32>
    %12 = arith.addf %10, %11 : vector<2x32xf32>
    %13 = math.tanh %12 : vector<2x32xf32>
    %14 = vector.broadcast %2 : vector<1x32xf32> to vector<2x32xf32>
    %15 = arith.mulf %13, %14 : vector<2x32xf32>
    %cst_10 = arith.constant dense<0.000000e+00> : vector<2xf32>
    %16 = vector.multi_reduction <add>, %15, %cst_10 [1] : vector<2x32xf32> to vector<2xf32>
    %17 = vector.shape_cast %16 : vector<2xf32> to vector<2x1xf32>
    %18 = vector.broadcast %8 : f32 to vector<2x1xf32>
    %19 = arith.addf %17, %18 : vector<2x1xf32>
    %20 = vector.extract_strided_slice %7 {offsets = [2, 0], sizes = [2, 32], strides = [1, 1]} : vector<16x32xf32> to vector<2x32xf32>
    %cst_11 = arith.constant dense<0.000000e+00> : vector<2x32xf32>
    %21 = tpu.matmul %13, %3, %cst_11 {dimension_numbers = #tpu.dot_dimension_numbers<[1], [0], [0], [1], [0, 0, 1, 1], [], []>} : vector<2x32xf32>, vector<32x32xf32>, vector<2x32xf32> -> vector<2x32xf32>
    %22 = arith.addf %20, %21 : vector<2x32xf32>
    %23 = math.tanh %22 : vector<2x32xf32>
    %24 = vector.broadcast %2 : vector<1x32xf32> to vector<2x32xf32>
    %25 = arith.mulf %23, %24 : vector<2x32xf32>
    %cst_12 = arith.constant dense<0.000000e+00> : vector<2xf32>
    %26 = vector.multi_reduction <add>, %25, %cst_12 [1] : vector<2x32xf32> to vector<2xf32>
    %27 = vector.shape_cast %26 : vector<2xf32> to vector<2x1xf32>
    %28 = vector.broadcast %8 : f32 to vector<2x1xf32>
    %29 = arith.addf %27, %28 : vector<2x1xf32>
    %30 = vector.extract_strided_slice %7 {offsets = [4, 0], sizes = [2, 32], strides = [1, 1]} : vector<16x32xf32> to vector<2x32xf32>
    %cst_13 = arith.constant dense<0.000000e+00> : vector<2x32xf32>
    %31 = tpu.matmul %23, %3, %cst_13 {dimension_numbers = #tpu.dot_dimension_numbers<[1], [0], [0], [1], [0, 0, 1, 1], [], []>} : vector<2x32xf32>, vector<32x32xf32>, vector<2x32xf32> -> vector<2x32xf32>
    %32 = arith.addf %30, %31 : vector<2x32xf32>
    %33 = math.tanh %32 : vector<2x32xf32>
    %34 = vector.broadcast %2 : vector<1x32xf32> to vector<2x32xf32>
    %35 = arith.mulf %33, %34 : vector<2x32xf32>
    %cst_14 = arith.constant dense<0.000000e+00> : vector<2xf32>
    %36 = vector.multi_reduction <add>, %35, %cst_14 [1] : vector<2x32xf32> to vector<2xf32>
    %37 = vector.shape_cast %36 : vector<2xf32> to vector<2x1xf32>
    %38 = vector.broadcast %8 : f32 to vector<2x1xf32>
    %39 = arith.addf %37, %38 : vector<2x1xf32>
    %40 = vector.extract_strided_slice %7 {offsets = [6, 0], sizes = [2, 32], strides = [1, 1]} : vector<16x32xf32> to vector<2x32xf32>
    %cst_15 = arith.constant dense<0.000000e+00> : vector<2x32xf32>
    %41 = tpu.matmul %33, %3, %cst_15 {dimension_numbers = #tpu.dot_dimension_numbers<[1], [0], [0], [1], [0, 0, 1, 1], [], []>} : vector<2x32xf32>, vector<32x32xf32>, vector<2x32xf32> -> vector<2x32xf32>
    %42 = arith.addf %40, %41 : vector<2x32xf32>
    %43 = math.tanh %42 : vector<2x32xf32>
    %44 = vector.broadcast %2 : vector<1x32xf32> to vector<2x32xf32>
    %45 = arith.mulf %43, %44 : vector<2x32xf32>
    %cst_16 = arith.constant dense<0.000000e+00> : vector<2xf32>
    %46 = vector.multi_reduction <add>, %45, %cst_16 [1] : vector<2x32xf32> to vector<2xf32>
    %47 = vector.shape_cast %46 : vector<2xf32> to vector<2x1xf32>
    %48 = vector.broadcast %8 : f32 to vector<2x1xf32>
    %49 = arith.addf %47, %48 : vector<2x1xf32>
    %50 = vector.extract_strided_slice %7 {offsets = [8, 0], sizes = [2, 32], strides = [1, 1]} : vector<16x32xf32> to vector<2x32xf32>
    %cst_17 = arith.constant dense<0.000000e+00> : vector<2x32xf32>
    %51 = tpu.matmul %43, %3, %cst_17 {dimension_numbers = #tpu.dot_dimension_numbers<[1], [0], [0], [1], [0, 0, 1, 1], [], []>} : vector<2x32xf32>, vector<32x32xf32>, vector<2x32xf32> -> vector<2x32xf32>
    %52 = arith.addf %50, %51 : vector<2x32xf32>
    %53 = math.tanh %52 : vector<2x32xf32>
    %54 = vector.broadcast %2 : vector<1x32xf32> to vector<2x32xf32>
    %55 = arith.mulf %53, %54 : vector<2x32xf32>
    %cst_18 = arith.constant dense<0.000000e+00> : vector<2xf32>
    %56 = vector.multi_reduction <add>, %55, %cst_18 [1] : vector<2x32xf32> to vector<2xf32>
    %57 = vector.shape_cast %56 : vector<2xf32> to vector<2x1xf32>
    %58 = vector.broadcast %8 : f32 to vector<2x1xf32>
    %59 = arith.addf %57, %58 : vector<2x1xf32>
    %60 = vector.extract_strided_slice %7 {offsets = [10, 0], sizes = [2, 32], strides = [1, 1]} : vector<16x32xf32> to vector<2x32xf32>
    %cst_19 = arith.constant dense<0.000000e+00> : vector<2x32xf32>
    %61 = tpu.matmul %53, %3, %cst_19 {dimension_numbers = #tpu.dot_dimension_numbers<[1], [0], [0], [1], [0, 0, 1, 1], [], []>} : vector<2x32xf32>, vector<32x32xf32>, vector<2x32xf32> -> vector<2x32xf32>
    %62 = arith.addf %60, %61 : vector<2x32xf32>
    %63 = math.tanh %62 : vector<2x32xf32>
    %64 = vector.broadcast %2 : vector<1x32xf32> to vector<2x32xf32>
    %65 = arith.mulf %63, %64 : vector<2x32xf32>
    %cst_20 = arith.constant dense<0.000000e+00> : vector<2xf32>
    %66 = vector.multi_reduction <add>, %65, %cst_20 [1] : vector<2x32xf32> to vector<2xf32>
    %67 = vector.shape_cast %66 : vector<2xf32> to vector<2x1xf32>
    %68 = vector.broadcast %8 : f32 to vector<2x1xf32>
    %69 = arith.addf %67, %68 : vector<2x1xf32>
    %70 = vector.extract_strided_slice %7 {offsets = [12, 0], sizes = [2, 32], strides = [1, 1]} : vector<16x32xf32> to vector<2x32xf32>
    %cst_21 = arith.constant dense<0.000000e+00> : vector<2x32xf32>
    %71 = tpu.matmul %63, %3, %cst_21 {dimension_numbers = #tpu.dot_dimension_numbers<[1], [0], [0], [1], [0, 0, 1, 1], [], []>} : vector<2x32xf32>, vector<32x32xf32>, vector<2x32xf32> -> vector<2x32xf32>
    %72 = arith.addf %70, %71 : vector<2x32xf32>
    %73 = math.tanh %72 : vector<2x32xf32>
    %74 = vector.broadcast %2 : vector<1x32xf32> to vector<2x32xf32>
    %75 = arith.mulf %73, %74 : vector<2x32xf32>
    %cst_22 = arith.constant dense<0.000000e+00> : vector<2xf32>
    %76 = vector.multi_reduction <add>, %75, %cst_22 [1] : vector<2x32xf32> to vector<2xf32>
    %77 = vector.shape_cast %76 : vector<2xf32> to vector<2x1xf32>
    %78 = vector.broadcast %8 : f32 to vector<2x1xf32>
    %79 = arith.addf %77, %78 : vector<2x1xf32>
    %80 = vector.extract_strided_slice %7 {offsets = [14, 0], sizes = [2, 32], strides = [1, 1]} : vector<16x32xf32> to vector<2x32xf32>
    %cst_23 = arith.constant dense<0.000000e+00> : vector<2x32xf32>
    %81 = tpu.matmul %73, %3, %cst_23 {dimension_numbers = #tpu.dot_dimension_numbers<[1], [0], [0], [1], [0, 0, 1, 1], [], []>} : vector<2x32xf32>, vector<32x32xf32>, vector<2x32xf32> -> vector<2x32xf32>
    %82 = arith.addf %80, %81 : vector<2x32xf32>
    %83 = math.tanh %82 : vector<2x32xf32>
    %84 = vector.broadcast %2 : vector<1x32xf32> to vector<2x32xf32>
    %85 = arith.mulf %83, %84 : vector<2x32xf32>
    %cst_24 = arith.constant dense<0.000000e+00> : vector<2xf32>
    %86 = vector.multi_reduction <add>, %85, %cst_24 [1] : vector<2x32xf32> to vector<2xf32>
    %87 = vector.shape_cast %86 : vector<2xf32> to vector<2x1xf32>
    %88 = vector.broadcast %8 : f32 to vector<2x1xf32>
    %89 = arith.addf %87, %88 : vector<2x1xf32>
    %90 = tpu.concatenate %19, %29, %39, %49, %59, %69, %79, %89 in 0 : vector<2x1xf32>, vector<2x1xf32>, vector<2x1xf32>, vector<2x1xf32>, vector<2x1xf32>, vector<2x1xf32>, vector<2x1xf32>, vector<2x1xf32> -> vector<16x1xf32>
    %c0_25 = arith.constant 0 : index
    %c0_26 = arith.constant 0 : index
    %91 = vector.load %arg4[%c0_25, %c0_26] : memref<16x1xf32, #tpu.memory_space<vmem>>, vector<16x1xf32>
    tpu.vector_store %arg4[%c0_25, %c0_26], %90 {strides = array<i32>} : memref<16x1xf32, #tpu.memory_space<vmem>>, vector<16x1xf32>,
    return
  }
}

</mosaic_0001>

<bundles_post_ra>
// kernel: tpu_custom_call.1
= control target key start
LH: loop header
LB: loop body
LE: loop exit
PB: predicated region body
PF: predicated region fallthrough
CT: control target
= control target key end

     0   :  { %10 = vsyncpa [#allocation4], 0  ;;  %s423_s18 = smov [#allocation3]   ;;  %s424_s20 = smov 128   ;;  %s518_s0 = inlined_call_operand.vmem [shape: f32[16,1], index: 0, kind: input, shape index: {}]   ;;  %s519_s1 = inlined_call_operand.vmem [shape: f32[3,32], index: 1, kind: input, shape index: {}]   ;;  %s520_s2 = inlined_call_operand.hbm [shape: f32[32,32], index: 2, kind: input, shape index: {}]   ;;  %s521_s3 = inlined_call_operand.<no memory space> [shape: f32[1], index: 3, kind: input, shape index: {}]   ;;  %s522_s4 = inlined_call_operand.vmem [shape: f32[16,1], index: 4, kind: output, shape index: {}]  }
   0x1   :  { %s19_s17 = sshll.u32 %s520_s2, 4  ;;  %s21_s19 = sshll.u32 %s423_s18, 4  ;;  %s20_s17 = int_to_ptr.hbm [resolvable:$true] %s19_s17  ;;  %s22_s19 = int_to_ptr.vmem [resolvable:$true] %s21_s19 }
   0x2   :  { %s425_s21 = smov 8  }
   0x3   :  { %27 = dma.hbm_to_vmem [thread:$0]  %s20_s17, 512, %s22_s19, [#allocation4], %s424_s20, %s424_s20, %s425_s21  }
   0x4   :  { %421 = dma.done.wait [#allocation4], 512  }
   0x5   :  { %422 = vsyncadd [#allocation4], 4294966784  ;;  %vm51_vm0 = vcmask 1040384   ;;  %vm44_vm1 = vcmask 7168   ;;  %v40_v0 = vld [vmem:[#allocation3 + $0x18] sm:$0xff]  ;;  %v39_v1 = vld [vmem:[#allocation3 + $0x10] sm:$0xff]  ;;  %v111_v41 = vstv %s521_s3 }
   0x6   :  { %v34_v2 = vld [vmem:[%s519_s1] sm:$0x1]  ;;  %95 = vmatpush.msra.mxu1 %v40_v0  ;;  %v38_v4 = vld [vmem:[#allocation3 + $0x8] sm:$0xff]  ;;  %128 = vmatpush.msra.mxu2 %v40_v0  ;;  %v426_v6 = vmov 0.0   ;;  %v465_v7 = vld [vmem:[%s519_s1 + $0x1] ss:$0 sm:$0xff] }
   0x7   :  { %365 = vmatpush.msk.msra.mxu0 %vm51_vm0, %v34_v2  ;;  %v41_v3 = vld [vmem:[%s518_s0] sm:$0xff]  ;;  %163 = vmatpush.msra.mxu3 %v40_v0  ;;  %vm79_vm2 = vcmask 261120   ;;  %vm107_vm3 = vcmask 254976   ;;  %vm142_vm4 = vcmask 257026   ;;  %vm177_vm5 = vcmask 259076   ;;  %v42_v30 = vld [vmem:[%s518_s0 + $0x8] sm:$0xff] }
   0x8   :  { %366 = vmatmul.msk.f32.vlgmr.msra.gmra.mxu0 %vm44_vm1, %v41_v3  ;;  %96 = vmatpush.msra.mxu1 %v39_v1  ;;  %v37_v5 = vld [vmem:[#allocation3] sm:$0xff]  ;;  %vm212_vm6 = vcmask 261126   ;;  %vm349_vm7 = vcmask 1041408   ;;  %vm351_vm8 = vcmask 1043456   ;;  %vm353_vm9 = vcmask 1045504  }
   0x9   :  { %129 = vmatpush.msra.mxu2 %v39_v1  ;;  %297 = vmatpush.msrb.mxu0 %v40_v0  ;;  %v471_v12 = vld [vmem:[%s519_s1 + $0x2] ss:$0 sm:$0xff] }
   0xa   :  { %97 = vmatpush.msra.mxu1 %v38_v4  ;;  %164 = vmatpush.msra.mxu3 %v39_v1 }
   0xb   :  { %130 = vmatpush.msra.mxu2 %v38_v4  ;;  %298 = vmatpush.msrb.mxu0 %v39_v1 }
   0xc   :  { %98 = vmatpush.msra.mxu1 %v37_v5  ;;  %165 = vmatpush.msra.mxu3 %v38_v4 }
   0xd   :  { %99 = vmatmul.f32.vlgmr.msra.gmra.mxu1 %v426_v6  ;;  %131 = vmatpush.msra.mxu2 %v37_v5 }
   0xe   :  { %166 = vmatpush.msra.mxu3 %v37_v5  ;;  %198 = vmatpush.msrb.mxu1 %v40_v0 }
   0xf   :  { %233 = vmatpush.msrb.mxu2 %v40_v0  ;;  %299 = vmatpush.msrb.mxu0 %v38_v4 }
  0x10   :  { %263 = vmatpush.msrb.mxu3 %v40_v0  ;;  %199 = vmatpush.msrb.mxu1 %v39_v1 }
  0x11   :  { %234 = vmatpush.msrb.mxu2 %v39_v1  ;;  %300 = vmatpush.msrb.mxu0 %v37_v5 }
  0x12   :  { %264 = vmatpush.msrb.mxu3 %v39_v1  ;;  %200 = vmatpush.msrb.mxu1 %v38_v4 }
  0x13   :  { %235 = vmatpush.msrb.mxu2 %v38_v4  ;;  %367 = vmatmul.msk.f32.gmra.mxu0 %vm44_vm1, %v42_v30 }
  0x14   :  { %265 = vmatpush.msrb.mxu3 %v38_v4  ;;  %201 = vmatpush.msrb.mxu1 %v37_v5 }
  0x15   :  { %236 = vmatpush.msrb.mxu2 %v37_v5 }
  0x16   :  { %266 = vmatpush.msrb.mxu3 %v37_v5  ;;  %331 = vmatpush.msra.mxu1 %v40_v0 }
  0x18   :  { %332 = vmatpush.msra.mxu1 %v39_v1 }
  0x1a   :  { %333 = vmatpush.msra.mxu1 %v38_v4 }
  0x1c   :  { %334 = vmatpush.msra.mxu1 %v37_v5 }
  0x85   :  { %v72_v8 = vpop.f32.mrf.mxu0 }
  0x86   :  { %v73_v9 = vadd.f32 %v465_v7, %v72_v8 }
  0x8a   :  { %v100_v10 = vpop.f32.mrf.mxu1 }
  0x8b   :  { %v103_v11 = vadd.f32 %v100_v10, %v73_v9 }
  0x8d   :  { %381 = vtanh.f32 %v103_v11 }
  0x90   :  { %v75_v50 = vpop.f32.mrf.mxu0 }
  0x91   :  { %v76_v51 = vadd.f32 %v465_v7, %v75_v50 }
  0x93   :  { %v382_v13 = vpop.eup %381 }
  0x94   :  { %368 = vmatmul.msk.f32.vlgmr.msra.gmra.mxu2 %vm79_vm2, %v382_v13  ;;  %v106_v14 = vmul.f32 %v382_v13, %v471_v12 }
  0x96   :  { %v108_v15 = vsel %vm107_vm3, %v106_v14, 0.0 }
  0x97   :  { %109 = vadd.xlane.f32.xlu0 %v108_v15 }
 0x10a   :  { %v110_v38 = vpop.xlane.xlu0 %109 }
 0x10b   :  { %v112_v44 = vadd.f32 %v111_v41, %v110_v38 }
 0x117   :  { %v133_v16 = vpop.f32.mrf.mxu2 }
 0x118   :  { %v137_v17 = vrot.slane %v133_v16, 6 }
 0x11a   :  { %v139_v18 = vadd.f32 %v137_v17, %v73_v9 }
 0x11c   :  { %383 = vtanh.f32 %v139_v18 }
 0x122   :  { %v384_v19 = vpop.eup %383 }
 0x123   :  { %v148_v20 = vrot.slane %v384_v19, 2  ;;  %v141_v21 = vmul.f32 %v384_v19, %v471_v12 }
 0x125   :  { %369 = vmatmul.msk.f32.vlgmr.msra.gmra.mxu3 %vm79_vm2, %v148_v20  ;;  %v143_v22 = vsel %vm142_vm4, %v141_v21, 0.0 }
 0x126   :  { %144 = vadd.xlane.f32.xlu0 %v143_v22 }
 0x199   :  { %v145_v39 = vpop.xlane.xlu0 %144 }
 0x19a   :  { %v146_v42 = vadd.f32 %v145_v39, %v111_v41 }
 0x19c   :  { %v350_v46 = vsel %vm349_vm7, %v112_v44, %v146_v42 }
 0x1a8   :  { %v168_v23 = vpop.f32.mrf.mxu3 }
 0x1a9   :  { %v172_v24 = vrot.slane %v168_v23, 4 }
 0x1ab   :  { %v174_v25 = vadd.f32 %v172_v24, %v73_v9 }
 0x1ad   :  { %385 = vtanh.f32 %v174_v25 }
 0x1b3   :  { %v386_v26 = vpop.eup %385 }
 0x1b4   :  { %v183_v27 = vrot.slane %v386_v26, 4  ;;  %v176_v28 = vmul.f32 %v386_v26, %v471_v12 }
 0x1b6   :  { %370 = vmatmul.msk.f32.vlgmr.msrb.gmra.mxu1 %vm79_vm2, %v183_v27  ;;  %v178_v29 = vsel %vm177_vm5, %v176_v28, 0.0 }
 0x1b7   :  { %179 = vadd.xlane.f32.xlu2 %v178_v29 }
 0x22a   :  { %v180_v40 = vpop.xlane.xlu2 %179 }
 0x22b   :  { %v181_v43 = vadd.f32 %v180_v40, %v111_v41 }
 0x22d   :  { %v352_v48 = vsel %vm351_vm8, %v350_v46, %v181_v43 }
 0x233   :  { %v203_v31 = vpop.f32.mrf.mxu1 }
 0x234   :  { %v207_v32 = vrot.slane %v203_v31, 2 }
 0x236   :  { %v209_v33 = vadd.f32 %v207_v32, %v73_v9 }
 0x238   :  { %387 = vtanh.f32 %v209_v33 }
 0x23e   :  { %v388_v34 = vpop.eup %387 }
 0x23f   :  { %v218_v35 = vrot.slane %v388_v34, 6  ;;  %v211_v36 = vmul.f32 %v388_v34, %v471_v12 }
 0x241   :  { %371 = vmatmul.msk.f32.vlgmr.msrb.gmra.mxu2 %vm79_vm2, %v218_v35  ;;  %v213_v37 = vsel %vm212_vm6, %v211_v36, 0.0 }
 0x242   :  { %214 = vadd.xlane.f32.xlu0 %v213_v37 }
 0x2b5   :  { %v215_v45 = vpop.xlane.xlu0 %214 }
 0x2b6   :  { %v216_v47 = vadd.f32 %v215_v45, %v111_v41 }
 0x2b8   :  { %v354_v49 = vsel %vm353_vm9, %v352_v48, %v216_v47 }
 0x2b9   :  { %358 = vst.msk [vmem:[%s522_s4] sm:$0xff] %vm44_vm1, %v354_v49 }
 0x2c4   :  { %v238_v52 = vpop.f32.mrf.mxu2 }
 0x2c5   :  { %v241_v53 = vadd.f32 %v238_v52, %v76_v51 }
 0x2c7   :  { %389 = vtanh.f32 %v241_v53 }
 0x2cd   :  { %v390_v54 = vpop.eup %389 }
 0x2ce   :  { %372 = vmatmul.msk.f32.vlgmr.msrb.gmra.mxu3 %vm79_vm2, %v390_v54  ;;  %v243_v55 = vmul.f32 %v390_v54, %v471_v12 }
 0x2d0   :  { %v244_v56 = vsel %vm107_vm3, %v243_v55, 0.0 }
 0x2d1   :  { %245 = vadd.xlane.f32.xlu1 %v244_v56 }
 0x344   :  { %v246_v14 = vpop.xlane.xlu1 %245 }
 0x345   :  { %v247_v19 = vadd.f32 %v246_v14, %v111_v41 }
 0x351   :  { %v268_v57 = vpop.f32.mrf.mxu3 }
 0x352   :  { %v272_v58 = vrot.slane %v268_v57, 6 }
 0x354   :  { %v274_v59 = vadd.f32 %v272_v58, %v76_v51 }
 0x356   :  { %391 = vtanh.f32 %v274_v59 }
 0x35c   :  { %v392_v60 = vpop.eup %391 }
 0x35d   :  { %v282_v61 = vrot.slane %v392_v60, 2  ;;  %v276_v62 = vmul.f32 %v392_v60, %v471_v12 }
 0x35f   :  { %373 = vmatmul.msk.f32.vlgmr.msrb.gmra.mxu0 %vm79_vm2, %v282_v61  ;;  %v277_v63 = vsel %vm142_vm4, %v276_v62, 0.0 }
 0x360   :  { %278 = vadd.xlane.f32.xlu1 %v277_v63 }
 0x3d3   :  { %v279_v15 = vpop.xlane.xlu1 %278 }
 0x3d4   :  { %v280_v17 = vadd.f32 %v279_v15, %v111_v41 }
 0x3d6   :  { %v355_v21 = vsel %vm349_vm7, %v247_v19, %v280_v17 }
 0x3dc   :  { %v302_v0 = vpop.f32.mrf.mxu0 }
 0x3dd   :  { %v306_v1 = vrot.slane %v302_v0, 4 }
 0x3df   :  { %v308_v2 = vadd.f32 %v306_v1, %v76_v51 }
 0x3e1   :  { %393 = vtanh.f32 %v308_v2 }
 0x3e7   :  { %v394_v3 = vpop.eup %393 }
 0x3e8   :  { %v316_v4 = vrot.slane %v394_v3, 4  ;;  %v310_v5 = vmul.f32 %v394_v3, %v471_v12 }
 0x3ea   :  { %374 = vmatmul.msk.f32.vlgmr.msra.gmra.mxu1 %vm79_vm2, %v316_v4  ;;  %v311_v6 = vsel %vm177_vm5, %v310_v5, 0.0 }
 0x3eb   :  { %312 = vadd.xlane.f32.xlu2 %v311_v6 }
 0x45e   :  { %v313_v16 = vpop.xlane.xlu2 %312 }
 0x45f   :  { %v314_v18 = vadd.f32 %v313_v16, %v111_v41 }
 0x461   :  { %v356_v23 = vsel %vm351_vm8, %v355_v21, %v314_v18 }
 0x467   :  { %v336_v7 = vpop.f32.mrf.mxu1 }
 0x468   :  { %v340_v8 = vrot.slane %v336_v7, 2 }
 0x46a   :  { %v342_v9 = vadd.f32 %v340_v8, %v76_v51 }
 0x46c   :  { %395 = vtanh.f32 %v342_v9 }
 0x472   :  { %v396_v10 = vpop.eup %395 }
 0x473   :  { %v344_v11 = vmul.f32 %v396_v10, %v471_v12 }
 0x475   :  { %v345_v13 = vsel %vm212_vm6, %v344_v11, 0.0 }
 0x476   :  { %346 = vadd.xlane.f32.xlu1 %v345_v13 }
 0x4e9   :  { %v347_v20 = vpop.xlane.xlu1 %346 }
 0x4ea   :  { %v348_v22 = vadd.f32 %v347_v20, %v111_v41 }
 0x4ec   :  { %v357_v24 = vsel %vm353_vm9, %v356_v23, %v348_v22 }
 0x4ed   :  { %359 = vst.msk [vmem:[%s522_s4 + $0x8] sm:$0xff] %vm44_vm1, %v357_v24 }
 0x4ee   :  { %364 = vsyncpa [#allocation4], 1 }

</bundles_post_ra>
